<compile_context>
chip_gen: v6e
topology: v6e:2x2x1
jax: 0.10.0
libtpu: 0.0.40
codegen_flags: <defaults>
</compile_context>

<pallas_src>
import math

import jax
import jax.numpy as jnp
from jax.experimental import pallas as pl
from jax.experimental.pallas import tpu as pltpu

_HALF_LOG_2PI = 0.5 * math.log(2.0 * math.pi)


# ---------------------------------------------------------------------------
# Kernels
# ---------------------------------------------------------------------------
def _lp_row_from_z(z, const):
    """-0.5 * rowsum(z*z) + const, emitted lane-dense as a (1, block_b) row."""
    lp_col = -0.5 * jnp.sum(z * z, axis=-1, keepdims=True) + const   # (bb, 1)
    # (bb, 1) -> (1, bb): small XLU relayout so the lp HBM writeback is
    # lane-dense instead of one masked lane per sublane.
    return jnp.transpose(lp_col)


def _flow_fwd_logprob_kernel(x_ref, us_ref, ub_ref, a_ref, b_ref, const_ref,
                             u_ref, lp_ref):
    x = x_ref[...].astype(jnp.float32)                    # (bb, D)
    # Flow.forward with {'mean','std'}: u = (x - mean) / std  (affine fused).
    u = us_ref[...] * x + ub_ref[...]
    u_ref[...] = u.astype(u_ref.dtype)
    # TODO(synk): Flow.net is None in the base class; the inner flow is modeled
    # as the identity bijection (u unchanged, sum_log_abs_det_jacobians == 0).
    # base_dist.log_prob(u): z = (u - base_mean)/base_scale, fused to a*x + b.
    # NOTE: base_dist_var (ones buffer) is used as the Normal *scale*, exactly
    # as the torch module does.
    z = a_ref[...] * x + b_ref[...]
    lp_ref[...] = _lp_row_from_z(z, const_ref[0, 0])


def _flow_logprob_kernel(x_ref, a_ref, b_ref, const_ref, lp_ref):
    x = x_ref[...].astype(jnp.float32)
    z = a_ref[...] * x + b_ref[...]
    lp_ref[...] = _lp_row_from_z(z, const_ref[0, 0])


# ---------------------------------------------------------------------------
# Tiling / VMEM helpers
# ---------------------------------------------------------------------------
def _sublane_multiple(dtype):
    # f32 -> 8, bf16 -> 16, int8/fp8 -> 32 (sub-32-bit dtypes pack sublanes).
    return max(8, 32 // jnp.dtype(dtype).itemsize)


def _vmem_budget_bytes():
    cap = 64 * 1024 * 1024                                # safe v7x lower bound
    try:
        info = pltpu.get_tpu_info()
        cap = int(getattr(info, "vmem_capacity_bytes", cap) or cap)
    except Exception:
        pass
    # Leave headroom for the compiler's internal scratch (important on v7x).
    return max(16 << 20, min(int(cap * 3 // 4), cap - (16 << 20)))


def _choose_block_b(B, D, itemsizes, *, target_x_tile_bytes, sublane_mult):
    """Pick the batch tile: big enough to amortize per-step overhead, small
    enough for double-buffered tiles to fit VMEM, and <= ceil(B/2) so a v7x
    chip can shard the parallel batch axis across both TensorCores."""
    if B <= sublane_mult:
        return int(B)                                      # full dim: always legal
    budget = _vmem_budget_bytes()
    per_row_pipelined = 2 * D * sum(itemsizes)             # double-buffered tiles
    rows_vmem = (budget - (4 << 20)) // max(per_row_pipelined, 1)
    rows_tgt = target_x_tile_bytes // max(D * itemsizes[0], 1)
    rows = min(rows_vmem, rows_tgt)
    rows = min(rows, (B + 1) // 2)                         # >= 2 grid steps
    rows = max(sublane_mult, (rows // sublane_mult) * sublane_mult)
    return int(rows)


def _vmem_limit(bb, D, itemsizes):
    live = (2 * bb * D * sum(itemsizes)       # double-buffered x (+ u) tiles
            + 2 * bb * 4                      # double-buffered (1, bb) lp rows
            + 16 * D * 4                      # (1, D) params
            + (2 << 20))                      # headroom
    return int(min(max(live, 4 << 20), _vmem_budget_bytes()))


def _fused_params(scale_mean, scale_std, base_mean, base_scale, D):
    sm = jnp.reshape(scale_mean, (1, D)).astype(jnp.float32)
    ss = jnp.reshape(scale_std, (1, D)).astype(jnp.float32)
    bm = jnp.reshape(base_mean, (1, D)).astype(jnp.float32)
    bs = jnp.reshape(base_scale, (1, D)).astype(jnp.float32)
    u_scale = 1.0 / ss                                     # u = u_scale*x + u_bias
    u_bias = -sm * u_scale
    a = u_scale / bs                                       # z = a*x + b
    b = (u_bias - bm) / bs
    const = jnp.sum(-jnp.log(bs)) - jnp.float32(D * _HALF_LOG_2PI)
    return u_scale, u_bias, a, b, jnp.reshape(const, (1, 1)).astype(jnp.float32)


def _param_spec(D):
    return pl.BlockSpec((1, D), lambda i: (0, 0))


def _smem_spec():
    return pl.BlockSpec(memory_space=pltpu.MemorySpace.SMEM)


# ---------------------------------------------------------------------------
# Wrappers
# ---------------------------------------------------------------------------
def flow_forward_and_logprob(x, scale_mean, scale_std, base_mean, base_scale,
                             *, block_b=None):
    """Returns (u, log_abs_det_jacobian, log_prob) matching Flow semantics."""
    B, D = x.shape
    itemsize = jnp.dtype(x.dtype).itemsize
    mult = _sublane_multiple(x.dtype)
    if block_b is None:
        block_b = _choose_block_b(B, D, (itemsize, itemsize),
                                  target_x_tile_bytes=4 << 20, sublane_mult=mult)
    bb = int(block_b)
    G = pl.cdiv(B, bb)
    u_scale, u_bias, a, b, const = _fused_params(
        scale_mean, scale_std, base_mean, base_scale, D)

    u, lp_tiles = pl.pallas_call(
        _flow_fwd_logprob_kernel,
        out_shape=(
            jax.ShapeDtypeStruct((B, D), x.dtype),         # u (ragged tail masked)
            jax.ShapeDtypeStruct((G, bb), jnp.float32),    # lane-dense lp rows
        ),
        grid=(G,),
        in_specs=[
            pl.BlockSpec((bb, D), lambda i: (i, 0)),
            _param_spec(D), _param_spec(D), _param_spec(D), _param_spec(D),
            _smem_spec(),
        ],
        out_specs=(
            pl.BlockSpec((bb, D), lambda i: (i, 0)),
            pl.BlockSpec((1, bb), lambda i: (i, 0)),
        ),
        compiler_params=pltpu.CompilerParams(
            dimension_semantics=("parallel",),
            vmem_limit_bytes=_vmem_limit(bb, D, (itemsize, itemsize))),
    )(x, u_scale, u_bias, a, b, const)

    lp = lp_tiles.reshape(-1)[:B]
    # log|det J| of the identity inner flow: zeros, never touched by the kernel.
    ladj = jnp.zeros((B, D), dtype=x.dtype)
    return u, ladj, lp


def flow_log_prob(x, scale_mean, scale_std, base_mean, base_scale,
                  *, block_b=None):
    """log_prob-only path: no u writeback, so larger batch tiles are used."""
    B, D = x.shape
    itemsize = jnp.dtype(x.dtype).itemsize
    mult = _sublane_multiple(x.dtype)
    if block_b is None:
        block_b = _choose_block_b(B, D, (itemsize,),
                                  target_x_tile_bytes=8 << 20, sublane_mult=mult)
    bb = int(block_b)
    G = pl.cdiv(B, bb)
    _, _, a, b, const = _fused_params(scale_mean, scale_std, base_mean, base_scale, D)

    lp_tiles = pl.pallas_call(
        _flow_logprob_kernel,
        out_shape=jax.ShapeDtypeStruct((G, bb), jnp.float32),
        grid=(G,),
        in_specs=[
            pl.BlockSpec((bb, D), lambda i: (i, 0)),
            _param_spec(D), _param_spec(D),
            _smem_spec(),
        ],
        out_specs=pl.BlockSpec((1, bb), lambda i: (i, 0)),
        compiler_params=pltpu.CompilerParams(
            dimension_semantics=("parallel",),
            vmem_limit_bytes=_vmem_limit(bb, D, (itemsize,))),
    )(x, a, b, const)
    return lp_tiles.reshape(-1)[:B]


# ---------------------------------------------------------------------------
# Self-test
# ---------------------------------------------------------------------------
if __name__ == "__main__":
    key = jax.random.PRNGKey(0)
    B, D = 8, 128                       # batch=8, input_size=128 (lane-aligned)
    kx, km, ks = jax.random.split(key, 3)

    x = jax.random.normal(kx, (B, D), dtype=jnp.float32)
    # Flow.scale = {'mean': ..., 'std': ...} (set via the `scale` setter)
    scale_mean = jax.random.normal(km, (D,), dtype=jnp.float32)
    scale_std = jnp.abs(jax.random.normal(ks, (D,), dtype=jnp.float32)) + 0.5
    # Registered buffers from Flow.__init__(input_size=D)
    base_dist_mean = jnp.zeros((D,), dtype=jnp.float32)
    base_dist_var = jnp.ones((D,), dtype=jnp.float32)

    u, ladj, lp = flow_forward_and_logprob(
        x, scale_mean, scale_std, base_dist_mean, base_dist_var)
    lp_only = flow_log_prob(x, scale_mean, scale_std, base_dist_mean, base_dist_var)
    jax.block_until_ready((u, ladj, lp, lp_only))

    # Reference in plain JAX (same semantics as the torch module).
    u_ref = (x - scale_mean[None, :]) / scale_std[None, :]
    lp_ref = jnp.sum(-0.5 * u_ref ** 2 - _HALF_LOG_2PI, axis=-1)

    assert u.shape == (B, D) and ladj.shape == (B, D) and lp.shape == (B,)
    assert jnp.allclose(u, u_ref, atol=1e-4, rtol=1e-5)
    assert float(jnp.max(jnp.abs(ladj))) == 0.0
    assert jnp.allclose(lp, lp_ref, atol=5e-3, rtol=1e-5)
    assert jnp.allclose(lp_only, lp_ref, atol=5e-3, rtol=1e-5)

    # Non-divisible batch (exercises the ragged cdiv grid, no padding copies).
    B2 = 10
    x2 = jax.random.normal(jax.random.PRNGKey(1), (B2, D), dtype=jnp.float32)
    u2, ladj2, lp2 = flow_forward_and_logprob(
        x2, scale_mean, scale_std, base_dist_mean, base_dist_var)
    lp2_only = flow_log_prob(x2, scale_mean, scale_std, base_dist_mean, base_dist_var)
    jax.block_until_ready((u2, ladj2, lp2, lp2_only))

    u2_ref = (x2 - scale_mean[None, :]) / scale_std[None, :]
    lp2_ref = jnp.sum(-0.5 * u2_ref ** 2 - _HALF_LOG_2PI, axis=-1)
    assert u2.shape == (B2, D) and lp2.shape == (B2,) and lp2_only.shape == (B2,)
    assert jnp.allclose(u2, u2_ref, atol=1e-4, rtol=1e-5)
    assert jnp.allclose(lp2, lp2_ref, atol=5e-3, rtol=1e-5)
    assert jnp.allclose(lp2_only, lp2_ref, atol=5e-3, rtol=1e-5)

    print("KERNEL_OK")
</pallas_src>

<mosaic_0001>
module attributes {stable_mosaic.version = 11 : i64} {
  func.func @_flow_fwd_logprob_kernel(%arg0: i32, %arg1: memref<8x128xf32, #tpu.memory_space<vmem>>, %arg2: memref<1x128xf32, #tpu.memory_space<vmem>>, %arg3: memref<1x128xf32, #tpu.memory_space<vmem>>, %arg4: memref<1x128xf32, #tpu.memory_space<vmem>>, %arg5: memref<1x128xf32, #tpu.memory_space<vmem>>, %arg6: memref<1x1xf32, #tpu.memory_space<smem>>, %arg7: memref<8x128xf32, #tpu.memory_space<vmem>>, %arg8: memref<1x8xf32, #tpu.memory_space<vmem>>) attributes {dimension_semantics = [#tpu.dimension_semantics<parallel>], iteration_bounds = array<i64: 1>, scalar_prefetch = 0 : i64, scratch_operands = 0 : i64, tpu.core_type = #tpu.core_type<tc>, window_params = [{transform_indices = @transform_0, window_bounds = array<i64: 8, 128>}, {pipeline_mode = #tpu.pipeline_mode<synchronous>, transform_indices = @transform_1, window_bounds = array<i64: 1, 128>}, {pipeline_mode = #tpu.pipeline_mode<synchronous>, transform_indices = @transform_2, window_bounds = array<i64: 1, 128>}, {pipeline_mode = #tpu.pipeline_mode<synchronous>, transform_indices = @transform_3, window_bounds = array<i64: 1, 128>}, {pipeline_mode = #tpu.pipeline_mode<synchronous>, transform_indices = @transform_4, window_bounds = array<i64: 1, 128>}, {transform_indices = @transform_5, window_bounds = array<i64: 1, 1>}, {transform_indices = @transform_6, window_bounds = array<i64: 8, 128>}, {transform_indices = @transform_7, window_bounds = array<i64: 1, 8>}]} {
    %c0 = arith.constant 0 : index
    %c0_0 = arith.constant 0 : index
    %0 = vector.load %arg1[%c0, %c0_0] : memref<8x128xf32, #tpu.memory_space<vmem>>, vector<8x128xf32>
    %c0_1 = arith.constant 0 : index
    %c0_2 = arith.constant 0 : index
    %1 = vector.load %arg2[%c0_1, %c0_2] : memref<1x128xf32, #tpu.memory_space<vmem>>, vector<1x128xf32>
    %2 = vector.broadcast %1 : vector<1x128xf32> to vector<8x128xf32>
    %3 = arith.mulf %2, %0 : vector<8x128xf32>
    %c0_3 = arith.constant 0 : index
    %c0_4 = arith.constant 0 : index
    %4 = vector.load %arg3[%c0_3, %c0_4] : memref<1x128xf32, #tpu.memory_space<vmem>>, vector<1x128xf32>
    %5 = vector.broadcast %4 : vector<1x128xf32> to vector<8x128xf32>
    %6 = arith.addf %3, %5 : vector<8x128xf32>
    %c0_5 = arith.constant 0 : index
    %c0_6 = arith.constant 0 : index
    %7 = vector.load %arg7[%c0_5, %c0_6] : memref<8x128xf32, #tpu.memory_space<vmem>>, vector<8x128xf32>
    tpu.vector_store %arg7[%c0_5, %c0_6], %6 {strides = array<i32>} : memref<8x128xf32, #tpu.memory_space<vmem>>, vector<8x128xf32>,
    %c0_7 = arith.constant 0 : index
    %c0_8 = arith.constant 0 : index
    %8 = vector.load %arg4[%c0_7, %c0_8] : memref<1x128xf32, #tpu.memory_space<vmem>>, vector<1x128xf32>
    %9 = vector.broadcast %8 : vector<1x128xf32> to vector<8x128xf32>
    %10 = arith.mulf %9, %0 : vector<8x128xf32>
    %c0_9 = arith.constant 0 : index
    %c0_10 = arith.constant 0 : index
    %11 = vector.load %arg5[%c0_9, %c0_10] : memref<1x128xf32, #tpu.memory_space<vmem>>, vector<1x128xf32>
    %12 = vector.broadcast %11 : vector<1x128xf32> to vector<8x128xf32>
    %13 = arith.addf %10, %12 : vector<8x128xf32>
    %c0_11 = arith.constant 0 : index
    %c0_12 = arith.constant 0 : index
    %14 = memref.load %arg6[%c0_11, %c0_12] : memref<1x1xf32, #tpu.memory_space<smem>>
    %15 = arith.mulf %13, %13 : vector<8x128xf32>
    %cst = arith.constant dense<0.000000e+00> : vector<8xf32>
    %16 = vector.multi_reduction <add>, %15, %cst [1] : vector<8x128xf32> to vector<8xf32>
    %17 = vector.shape_cast %16 : vector<8xf32> to vector<8x1xf32>
    %cst_13 = arith.constant -5.000000e-01 : f32
    %18 = vector.broadcast %cst_13 : f32 to vector<8x1xf32>
    %19 = arith.mulf %18, %17 : vector<8x1xf32>
    %20 = vector.broadcast %14 : f32 to vector<8x1xf32>
    %21 = arith.addf %19, %20 : vector<8x1xf32>
    %22 = tpu.transpose %21, [1, 0] : vector<8x1xf32> -> vector<1x8xf32>
    %c0_14 = arith.constant 0 : index
    %c0_15 = arith.constant 0 : index
    %23 = vector.load %arg8[%c0_14, %c0_15] : memref<1x8xf32, #tpu.memory_space<vmem>>, vector<1x8xf32>
    tpu.vector_store %arg8[%c0_14, %c0_15], %22 {strides = array<i32>} : memref<1x8xf32, #tpu.memory_space<vmem>>, vector<1x8xf32>,
    return
  }
  func.func @transform_0(%arg0: i32) -> (i32, i32) {
    %c0_i32 = arith.constant 0 : i32
    %c0_i32_0 = arith.constant 0 : i32
    return %arg0, %c0_i32 : i32, i32
  }
  func.func @transform_1(%arg0: i32) -> (i32, i32) {
    %c0_i32 = arith.constant 0 : i32
    %c0_i32_0 = arith.constant 0 : i32
    %c0_i32_1 = arith.constant 0 : i32
    return %c0_i32, %c0_i32_0 : i32, i32
  }
  func.func @transform_2(%arg0: i32) -> (i32, i32) {
    %c0_i32 = arith.constant 0 : i32
    %c0_i32_0 = arith.constant 0 : i32
    %c0_i32_1 = arith.constant 0 : i32
    return %c0_i32, %c0_i32_0 : i32, i32
  }
  func.func @transform_3(%arg0: i32) -> (i32, i32) {
    %c0_i32 = arith.constant 0 : i32
    %c0_i32_0 = arith.constant 0 : i32
    %c0_i32_1 = arith.constant 0 : i32
    return %c0_i32, %c0_i32_0 : i32, i32
  }
  func.func @transform_4(%arg0: i32) -> (i32, i32) {
    %c0_i32 = arith.constant 0 : i32
    %c0_i32_0 = arith.constant 0 : i32
    %c0_i32_1 = arith.constant 0 : i32
    return %c0_i32, %c0_i32_0 : i32, i32
  }
  func.func @transform_5(%arg0: i32) -> (i32, i32) {
    %c0_i32 = arith.constant 0 : i32
    %c0_i32_0 = arith.constant 0 : i32
    %c0_i32_1 = arith.constant 0 : i32
    return %c0_i32, %c0_i32_0 : i32, i32
  }
  func.func @transform_6(%arg0: i32) -> (i32, i32) {
    %c0_i32 = arith.constant 0 : i32
    %c0_i32_0 = arith.constant 0 : i32
    return %arg0, %c0_i32 : i32, i32
  }
  func.func @transform_7(%arg0: i32) -> (i32, i32) {
    %c0_i32 = arith.constant 0 : i32
    %c0_i32_0 = arith.constant 0 : i32
    return %arg0, %c0_i32 : i32, i32
  }
}

</mosaic_0001>

<bundles_post_ra>
// kernel: tpu_custom_call.1
= control target key start
LH: loop header
LB: loop body
LE: loop exit
PB: predicated region body
PF: predicated region fallthrough
CT: control target
= control target key end

     0   :  { %14 = vsyncpa [#allocation4], 0  ;;  %s285_s0 = inlined_call_operand.hbm [shape: f32[8,128], index: 0, kind: input, shape index: {}]   ;;  %s286_s1 = inlined_call_operand.vmem [shape: f32[1,128], index: 1, kind: input, shape index: {}]   ;;  %s287_s2 = inlined_call_operand.vmem [shape: f32[1,128], index: 2, kind: input, shape index: {}]   ;;  %s288_s3 = inlined_call_operand.vmem [shape: f32[1,128], index: 3, kind: input, shape index: {}]   ;;  %s289_s4 = inlined_call_operand.vmem [shape: f32[1,128], index: 4, kind: input, shape index: {}]   ;;  %s290_s5 = inlined_call_operand.<no memory space> [shape: f32[1,1], index: 5, kind: input, shape index: {}]   ;;  %s291_s6 = inlined_call_operand.hbm [shape: f32[8,128], index: 6, kind: output, shape index: {0}]   ;;  %s292_s7 = inlined_call_operand.hbm [shape: f32[1,8], index: 7, kind: output, shape index: {1}]  }
   0x1   :  { %15 = vsyncpa [#allocation5], 0 }
   0x2   :  { %16 = vsyncpa [#allocation8], 0  ;;  %s218_s24 = smov [#allocation3]  }
   0x3   :  { %s23_s25 = sshll.u32 %s218_s24, 4  ;;  %s24_s25 = int_to_ptr.vmem [resolvable:$true] %s23_s25 }
   0x4   :  { %s160_s26 = scalar_lea.vmem %s24_s25, 128  ;;  %p165_p1 = scmp.lt.s32.totalorder %s24_s25, %s24_s25 }
   0x5   :  { %p161_p0 = scmp.ne.s32.totalorder %s24_s25, %s160_s26  ;;  %p166_p2 = scmp.lt.s32.totalorder %s160_s26, %s160_s26 }
   0x7   :  { %p167_p3 = por %p166_p2, %p165_p1 }
   0x9   :  { %p168_p4 = pnand %p167_p3, %p161_p0 }
   0xb   :  { %171 = shalt.err (!%p168_p4)
}
   0xc   :  { %26 = dma.hbm_to_vmem [thread:$0]  %s285_s0, 128, %s24_s25, [#allocation4]  }
   0xd   :  { %212 = dma.done.wait [#allocation4], 128  }
   0xe   :  { %213 = vsyncadd [#allocation4], 4294967168  ;;  %v40_v0 = vld [vmem:[#allocation3] sm:$0xff]  ;;  %v79_v10 = vstv %s290_s5 }
   0xf   :  { %v146_v1 = vld [vmem:[%s288_s3] ss:$0 sm:$0xff] }
  0x10   :  { %v65_v2 = vmul.f32 %v146_v1, %v40_v0  ;;  %v147_v3 = vld [vmem:[%s289_s4] ss:$0 sm:$0xff]  ;;  %s219_s4 = smov [#allocation6]  }
  0x11   :  { %v144_v6 = vld [vmem:[%s286_s1] ss:$0 sm:$0xff]  ;;  %s121_s14 = sshll.u32 %s219_s4, 4  ;;  %s122_s14 = int_to_ptr.vmem [resolvable:$true] %s121_s14 }
  0x12   :  { %v73_v4 = vadd.f32 %v147_v3, %v65_v2  ;;  %v48_v7 = vmul.f32 %v144_v6, %v40_v0  ;;  %v145_v8 = vld [vmem:[%s287_s2] ss:$0 sm:$0xff]  ;;  %s172_s15 = scalar_lea.vmem %s122_s14, 128  ;;  %p177_p6 = scmp.lt.s32.totalorder %s122_s14, %s122_s14 }
  0x13   :  { %p173_p5 = scmp.ne.s32.totalorder %s122_s14, %s172_s15  ;;  %p178_p7 = scmp.lt.s32.totalorder %s172_s15, %s172_s15 }
  0x14   :  { %v75_v5 = vmul.f32 %v73_v4, %v73_v4  ;;  %v56_v11 = vadd.f32 %v145_v8, %v48_v7 }
  0x15   :  { %p179_p8 = por %p178_p7, %p177_p6 }
  0x16   :  { %76 = vadd.xlane.f32.xlu0 %v75_v5  ;;  %57 = vst [vmem:[#allocation6] sm:$0xff] %v56_v11 }
  0x17   :  { %p180_p9 = pnand %p179_p8, %p173_p5 }
  0x9f   :  { %v77_v9 = vpop.xlane.xlu0 %76 }
  0xa0   :  { %v78_v12 = vmul.f32 -0.5, %v77_v9 }
  0xa2   :  { %v80_v13 = vadd.f32 %v79_v10, %v78_v12 }
  0xa3   :  { %183 = shalt.err (!%p180_p9)
}
  0xa4   :  { %124 = dma.vmem_to_hbm [thread:$0]  %s122_s14, 128, %s291_s6, [#allocation5]   ;;  %81 = vxpose.xlu0.b32.start.end [1/1] (short) (narrow) %v80_v13, 8  ;;  %vm113_vm0 = vcmask 57344  }
  0xa5   :  { %s220_s5 = smov [#allocation7]  }
  0xa6   :  { %s131_s16 = sshll.u32 %s220_s5, 4  ;;  %s132_s16 = int_to_ptr.vmem [resolvable:$true] %s131_s16 }
  0xa7   :  { %s192_s17 = scalar_lea.vmem %s132_s16, 16  ;;  %s196_s18 = scalar_lea.vmem %s132_s16, 32 }
  0xa8   :  { %p193_p10 = scmp.ne.s32.totalorder %s132_s16, %s192_s17  ;;  %p197_p11 = scmp.lt.s32.totalorder %s132_s16, %s132_s16 }
  0xa9   :  { %p198_p12 = scmp.lt.s32.totalorder %s196_s18, %s192_s17 }
  0xab   :  { %p199_p13 = por %p198_p12, %p197_p11 }
  0xad   :  { %p200_p0 = pnand %p199_p13, %p193_p10 }
 0x120   :  { %v97_v14 = vpop.trf.xlu0 }
 0x121   :  { %114 = vst.msk [vmem:[#allocation7] sm:$0x1] %vm113_vm0, %v97_v14 }
 0x122   :  { %203 = shalt.err (!%p200_p0)
}
 0x123   :  { %134 = dma.vmem_to_hbm [thread:$0]  %s132_s16, 16, %s292_s7, [#allocation8]  }
 0x124   :  { %214 = dma.done.wait [#allocation5], 128  }
 0x125   :  { %215 = vsyncadd [#allocation5], 4294967168 }
 0x126   :  { %216 = dma.done.wait [#allocation8], 16  }
 0x127   :  { %217 = vsyncadd [#allocation8], 4294967280 }
 0x128   :  { %141 = vsyncpa [#allocation4], 1 }
 0x129   :  { %142 = vsyncpa [#allocation5], 1 }
 0x12a   :  { %143 = vsyncpa [#allocation8], 1 }

</bundles_post_ra>
